<compile_context>
chip_gen: v7x
topology: tpu7x:2x2x1
jax: 0.10.0
libtpu: 0.0.40
codegen_flags: <defaults>
</compile_context>

<pallas_src>
import functools

import jax
import jax.numpy as jnp
from jax.experimental import pallas as pl
from jax.experimental.pallas import tpu as pltpu

LN_EPS = 1e-5                      # torch.nn.LayerNorm default eps

_HBM_BYTES_PER_STEP = 4 << 20      # target HBM traffic moved per grid step
_VMEM_TILE_BUDGET = 24 << 20       # budget for the per-step VMEM footprint
_VMEM_LIMIT_BYTES = 48 << 20       # explicit scoped-VMEM limit (all gens)


def _round_up(x, m):
    return ((x + m - 1) // m) * m


def _choose_tm(m_rows, in_cols, out_cols, itemsize):
    """Row-tile size: large enough to amortize ~0.35us/step grid overhead
    against the HBM roofline, small enough to fit VMEM and to leave >= 8 grid
    steps for megacore sharding when the problem is big enough."""
    hbm_row = (in_cols + out_cols) * itemsize
    # VMEM per row: double-buffered input tile (lane-padded to 128 in VMEM),
    # double-buffered output tile, plus ~3 f32 intermediates of width out_cols
    # (h, per-lane statistics, normalized values).
    vmem_row = (2 * _round_up(in_cols, 128) * itemsize
                + 2 * out_cols * itemsize
                + 3 * out_cols * 4)
    tm = _HBM_BYTES_PER_STEP // hbm_row
    tm = min(tm, _VMEM_TILE_BUDGET // vmem_row)
    tm = min(tm, pl.cdiv(m_rows, 8))          # keep >= 8 steps when possible
    return max(8, (tm // 8) * 8)


def _conv_ln_kernel_packed(x_ref, w_ref, p_ref, seg_ref, o_ref):
    """r patches packed per row; per-patch LN stats via segment-avg matmuls.

    x_ref  : (tm, r*ps)   packed patch rows (native dtype)
    w_ref  : (r*ps, F)    block-diagonal conv weight, F = r*hid_dim (lane dense)
    p_ref  : (3, F)       rows = [conv_bias, gamma, beta], each tiled r times (f32)
    seg_ref: (F, F)       block-diag segment-averaging matrix (1/hid_dim blocks)
    o_ref  : (tm, F)
    """
    h = jnp.dot(x_ref[...], w_ref[...], preferred_element_type=jnp.float32)
    h = h + p_ref[0:1, :]
    # Per-segment mean / E[x^2], already broadcast across each segment's lanes.
    mean = jnp.dot(h, seg_ref[...], preferred_element_type=jnp.float32)
    ex2 = jnp.dot(h * h, seg_ref[...], preferred_element_type=jnp.float32)
    var = ex2 - mean * mean
    xn = (h - mean) * jax.lax.rsqrt(var + LN_EPS)
    o_ref[...] = (xn * p_ref[1:2, :] + p_ref[2:3, :]).astype(o_ref.dtype)


def _conv_ln_kernel_rowwise(x_ref, w_ref, p_ref, o_ref, *, inv_d):
    """One patch per row; feature axis zero-padded to a multiple of 128.

    Pad lanes have zero weight columns and zero bias, so they contribute
    exactly 0 to both one-pass sums (no lane mask needed).
    """
    h = jnp.dot(x_ref[...], w_ref[...], preferred_element_type=jnp.float32)
    h = h + p_ref[0:1, :]
    mean = jnp.sum(h, axis=-1, keepdims=True) * inv_d
    ex2 = jnp.sum(h * h, axis=-1, keepdims=True) * inv_d
    var = ex2 - mean * mean
    xn = (h - mean) * jax.lax.rsqrt(var + LN_EPS)
    o_ref[...] = (xn * p_ref[1:2, :] + p_ref[2:3, :]).astype(o_ref.dtype)


def conv_layer_norm(x, conv_w, conv_b, gamma, beta, *, patch_size):
    """x: (B, spec_len) -> (B, P, hid_dim), P = spec_len // patch_size."""
    B, spec_len = x.shape
    assert spec_len % patch_size == 0, "stride==kernel conv needs ps | spec_len"
    P = spec_len // patch_size
    hid_dim = conv_w.shape[0]
    M = B * P
    dt = x.dtype

    w_t = conv_w.reshape(hid_dim, patch_size).astype(jnp.float32).T  # (ps, hid)
    cb = conv_b.astype(jnp.float32)
    g = gamma.astype(jnp.float32)
    bt = beta.astype(jnp.float32)

    # Pack r patches per matmul row when that makes the output exactly
    # lane-dense (hid_dim divides 128); otherwise one patch per row with the
    # feature axis zero-padded up to a multiple of 128.
    if hid_dim < 128 and 128 % hid_dim == 0 and M % (128 // hid_dim) == 0:
        r = 128 // hid_dim
    else:
        r = 1
        # TODO(synk): hid_dim that neither divides nor is a multiple of 128
        # still pays pad lanes plus a wrapper-side [:, :hid_dim] copy.

    if r > 1:
        F = r * hid_dim                                    # == 128
        m_rows = M // r
        x_rows = x.reshape(m_rows, r * patch_size)
        eye_r = jnp.eye(r, dtype=jnp.float32)
        w_in = jnp.kron(eye_r, w_t).astype(dt)             # (r*ps, F) block-diag
        params = jnp.stack([jnp.tile(cb, r), jnp.tile(g, r), jnp.tile(bt, r)])
        seg = jnp.kron(eye_r, jnp.full((hid_dim, hid_dim), 1.0 / hid_dim,
                                       jnp.float32))       # (F, F)
        kernel = _conv_ln_kernel_packed
        extra_args = (seg,)
        extra_specs = [pl.BlockSpec((F, F), lambda i: (0, 0))]
    else:
        F = _round_up(max(hid_dim, 128), 128)
        pad = F - hid_dim
        m_rows = M
        x_rows = x.reshape(m_rows, patch_size)
        w_in = jnp.pad(w_t, ((0, 0), (0, pad))).astype(dt)
        params = jnp.stack([jnp.pad(cb, (0, pad)),
                            jnp.pad(g, (0, pad)),
                            jnp.pad(bt, (0, pad))])
        kernel = functools.partial(_conv_ln_kernel_rowwise, inv_d=1.0 / hid_dim)
        extra_args = ()
        extra_specs = []

    in_cols = x_rows.shape[1]
    tm = _choose_tm(m_rows, in_cols, F, dt.itemsize)
    if tm >= m_rows:
        tm = m_rows    # single step; block == full array is always legal

    out = pl.pallas_call(
        kernel,
        out_shape=jax.ShapeDtypeStruct((m_rows, F), dt),
        grid=(pl.cdiv(m_rows, tm),),   # edge block (if any) is masked by Pallas
        in_specs=[pl.BlockSpec((tm, in_cols), lambda i: (i, 0)),
                  pl.BlockSpec((in_cols, F), lambda i: (0, 0)),
                  pl.BlockSpec((3, F), lambda i: (0, 0)),
                  *extra_specs],
        out_specs=pl.BlockSpec((tm, F), lambda i: (i, 0)),
        compiler_params=pltpu.CompilerParams(
            dimension_semantics=("parallel",),
            vmem_limit_bytes=_VMEM_LIMIT_BYTES),
    )(x_rows, w_in, params, *extra_args)

    if r > 1:
        return out.reshape(B, P, hid_dim)     # contiguous view, no copy
    if F != hid_dim:
        out = out[:, :hid_dim]
    return out.reshape(B, P, hid_dim)


def reference(x, conv_w, conv_b, gamma, beta, *, patch_size):
    B, spec_len = x.shape
    P = spec_len // patch_size
    hid_dim = conv_w.shape[0]
    xp = x.reshape(B, P, patch_size).astype(jnp.float32)
    w = conv_w.reshape(hid_dim, patch_size).astype(jnp.float32)
    h = jnp.einsum("bpk,hk->bph", xp, w,
                   precision=jax.lax.Precision.HIGHEST) + conv_b.astype(jnp.float32)
    mean = jnp.mean(h, axis=-1, keepdims=True)
    var = jnp.mean((h - mean) ** 2, axis=-1, keepdims=True)
    xn = (h - mean) * jax.lax.rsqrt(var + LN_EPS)
    return xn * gamma.astype(jnp.float32) + beta.astype(jnp.float32)


if __name__ == "__main__":
    # Small shapes consistent with the module's forward contract.
    B, spec_len = 2, 128
    patch_size, hid_dim = 16, 32       # P = 8, M = 16, packing factor r = 4

    key = jax.random.PRNGKey(0)
    k_x, k_w, k_b = jax.random.split(key, 3)

    x = jax.random.normal(k_x, (B, spec_len), dtype=jnp.float32)

    # Parameters with the same shapes as the PyTorch module:
    #   Conv1d.weight: (hid_dim, 1, patch_size), Conv1d.bias: (hid_dim,)
    #   LayerNorm.weight: ones(hid_dim), LayerNorm.bias: zeros(hid_dim)
    bound = 1.0 / (patch_size ** 0.5)
    conv_w = jax.random.uniform(k_w, (hid_dim, 1, patch_size),
                                minval=-bound, maxval=bound, dtype=jnp.float32)
    conv_b = jax.random.uniform(k_b, (hid_dim,),
                                minval=-bound, maxval=bound, dtype=jnp.float32)
    gamma = jnp.ones((hid_dim,), jnp.float32)
    beta = jnp.zeros((hid_dim,), jnp.float32)

    out = conv_layer_norm(x, conv_w, conv_b, gamma, beta,
                          patch_size=patch_size)
    out = jax.block_until_ready(out)

    ref = reference(x, conv_w, conv_b, gamma, beta, patch_size=patch_size)
    assert out.shape == (B, spec_len // patch_size, hid_dim)
    # Tolerance sized so the check is robust to the MXU's default f32 matmul
    # precision while still catching any semantic error (those are O(0.1+)).
    assert jnp.allclose(out, ref, atol=3e-3, rtol=3e-3), (
        float(jnp.max(jnp.abs(out - ref))))

    print("KERNEL_OK")
</pallas_src>

<mosaic_0001>
module attributes {stable_mosaic.version = 11 : i64} {
  func.func @_conv_ln_kernel_packed(%arg0: i32, %arg1: memref<4x64xf32, #tpu.memory_space<vmem>>, %arg2: memref<64x128xf32, #tpu.memory_space<vmem>>, %arg3: memref<3x128xf32, #tpu.memory_space<vmem>>, %arg4: memref<128x128xf32, #tpu.memory_space<vmem>>, %arg5: memref<4x128xf32, #tpu.memory_space<vmem>>) attributes {dimension_semantics = [#tpu.dimension_semantics<parallel>], iteration_bounds = array<i64: 1>, scalar_prefetch = 0 : i64, scratch_operands = 0 : i64, tpu.core_type = #tpu.core_type<tc>, window_params = [{transform_indices = @transform_0, window_bounds = array<i64: 4, 64>}, {pipeline_mode = #tpu.pipeline_mode<synchronous>, transform_indices = @transform_1, window_bounds = array<i64: 64, 128>}, {pipeline_mode = #tpu.pipeline_mode<synchronous>, transform_indices = @transform_2, window_bounds = array<i64: 3, 128>}, {pipeline_mode = #tpu.pipeline_mode<synchronous>, transform_indices = @transform_3, window_bounds = array<i64: 128, 128>}, {transform_indices = @transform_4, window_bounds = array<i64: 4, 128>}]} {
    %c0 = arith.constant 0 : index
    %c0_0 = arith.constant 0 : index
    %0 = vector.load %arg1[%c0, %c0_0] : memref<4x64xf32, #tpu.memory_space<vmem>>, vector<4x64xf32>
    %c0_1 = arith.constant 0 : index
    %c0_2 = arith.constant 0 : index
    %1 = vector.load %arg2[%c0_1, %c0_2] : memref<64x128xf32, #tpu.memory_space<vmem>>, vector<64x128xf32>
    %cst = arith.constant dense<0.000000e+00> : vector<4x128xf32>
    %2 = tpu.matmul %0, %1, %cst {dimension_numbers = #tpu.dot_dimension_numbers<[1], [0], [0], [1], [0, 0, 1, 1], [], []>} : vector<4x64xf32>, vector<64x128xf32>, vector<4x128xf32> -> vector<4x128xf32>
    %c0_3 = arith.constant 0 : index
    %c0_4 = arith.constant 0 : index
    %3 = vector.load %arg3[%c0_3, %c0_4] : memref<3x128xf32, #tpu.memory_space<vmem>>, vector<1x128xf32>
    %4 = vector.broadcast %3 : vector<1x128xf32> to vector<4x128xf32>
    %5 = arith.addf %2, %4 : vector<4x128xf32>
    %c0_5 = arith.constant 0 : index
    %c0_6 = arith.constant 0 : index
    %6 = vector.load %arg4[%c0_5, %c0_6] : memref<128x128xf32, #tpu.memory_space<vmem>>, vector<128x128xf32>
    %cst_7 = arith.constant dense<0.000000e+00> : vector<4x128xf32>
    %7 = tpu.matmul %5, %6, %cst_7 {dimension_numbers = #tpu.dot_dimension_numbers<[1], [0], [0], [1], [0, 0, 1, 1], [], []>} : vector<4x128xf32>, vector<128x128xf32>, vector<4x128xf32> -> vector<4x128xf32>
    %8 = arith.mulf %5, %5 : vector<4x128xf32>
    %c0_8 = arith.constant 0 : index
    %c0_9 = arith.constant 0 : index
    %9 = vector.load %arg4[%c0_8, %c0_9] : memref<128x128xf32, #tpu.memory_space<vmem>>, vector<128x128xf32>
    %cst_10 = arith.constant dense<0.000000e+00> : vector<4x128xf32>
    %10 = tpu.matmul %8, %9, %cst_10 {dimension_numbers = #tpu.dot_dimension_numbers<[1], [0], [0], [1], [0, 0, 1, 1], [], []>} : vector<4x128xf32>, vector<128x128xf32>, vector<4x128xf32> -> vector<4x128xf32>
    %11 = arith.mulf %7, %7 : vector<4x128xf32>
    %12 = arith.subf %10, %11 : vector<4x128xf32>
    %13 = arith.subf %5, %7 : vector<4x128xf32>
    %cst_11 = arith.constant 9.99999974E-6 : f32
    %14 = vector.broadcast %cst_11 : f32 to vector<4x128xf32>
    %15 = arith.addf %12, %14 : vector<4x128xf32>
    %16 = math.rsqrt %15 : vector<4x128xf32>
    %17 = arith.mulf %13, %16 : vector<4x128xf32>
    %c1 = arith.constant 1 : index
    %c0_12 = arith.constant 0 : index
    %18 = vector.load %arg3[%c1, %c0_12] : memref<3x128xf32, #tpu.memory_space<vmem>>, vector<1x128xf32>
    %19 = vector.broadcast %18 : vector<1x128xf32> to vector<4x128xf32>
    %20 = arith.mulf %17, %19 : vector<4x128xf32>
    %c2 = arith.constant 2 : index
    %c0_13 = arith.constant 0 : index
    %21 = vector.load %arg3[%c2, %c0_13] : memref<3x128xf32, #tpu.memory_space<vmem>>, vector<1x128xf32>
    %22 = vector.broadcast %21 : vector<1x128xf32> to vector<4x128xf32>
    %23 = arith.addf %20, %22 : vector<4x128xf32>
    %c0_14 = arith.constant 0 : index
    %c0_15 = arith.constant 0 : index
    %24 = vector.load %arg5[%c0_14, %c0_15] : memref<4x128xf32, #tpu.memory_space<vmem>>, vector<4x128xf32>
    tpu.vector_store %arg5[%c0_14, %c0_15], %23 {strides = array<i32>} : memref<4x128xf32, #tpu.memory_space<vmem>>, vector<4x128xf32>,
    return
  }
  func.func @transform_0(%arg0: i32) -> (i32, i32) {
    %c0_i32 = arith.constant 0 : i32
    %c0_i32_0 = arith.constant 0 : i32
    return %arg0, %c0_i32 : i32, i32
  }
  func.func @transform_1(%arg0: i32) -> (i32, i32) {
    %c0_i32 = arith.constant 0 : i32
    %c0_i32_0 = arith.constant 0 : i32
    %c0_i32_1 = arith.constant 0 : i32
    return %c0_i32, %c0_i32_0 : i32, i32
  }
  func.func @transform_2(%arg0: i32) -> (i32, i32) {
    %c0_i32 = arith.constant 0 : i32
    %c0_i32_0 = arith.constant 0 : i32
    %c0_i32_1 = arith.constant 0 : i32
    return %c0_i32, %c0_i32_0 : i32, i32
  }
  func.func @transform_3(%arg0: i32) -> (i32, i32) {
    %c0_i32 = arith.constant 0 : i32
    %c0_i32_0 = arith.constant 0 : i32
    %c0_i32_1 = arith.constant 0 : i32
    return %c0_i32, %c0_i32_0 : i32, i32
  }
  func.func @transform_4(%arg0: i32) -> (i32, i32) {
    %c0_i32 = arith.constant 0 : i32
    %c0_i32_0 = arith.constant 0 : i32
    return %arg0, %c0_i32 : i32, i32
  }
}

</mosaic_0001>

<bundles_post_ra>
// kernel: tpu_custom_call.1
= control target key start
LH: loop header
LB: loop body
LE: loop exit
PB: predicated region body
PF: predicated region fallthrough
CT: control target
= control target key end

     0   :  { %9 = vsyncpa [#allocation3], 0  ;;  %s758_s0 = inlined_call_operand.hbm [shape: f32[4,64], index: 0, kind: input, shape index: {}]   ;;  %s759_s1 = inlined_call_operand.hbm [shape: f32[64,128], index: 1, kind: input, shape index: {}]   ;;  %s760_s2 = inlined_call_operand.vmem [shape: f32[3,128], index: 2, kind: input, shape index: {}]   ;;  %s761_s3 = inlined_call_operand.hbm [shape: f32[128,128], index: 3, kind: input, shape index: {}]   ;;  %s762_s4 = inlined_call_operand.hbm [shape: f32[4,128], index: 4, kind: output, shape index: {}]  }
   0x1   :  { %10 = vsyncpa [#allocation6], 0 }
   0x2   :  { %11 = vsyncpa [#allocation4], 0  ;;  %s638_s15 = smov [#allocation5]   ;;  %s544_s19 = scalar_lea.hbm %s759_s1, 1024 }
   0x3   :  { %s27_s16 = sshll.u32 %s638_s15, 4  ;;  %p545_p0 = scmp.ne.s32.totalorder %s759_s1, %s544_s19  ;;  %s28_s16 = int_to_ptr.vmem [resolvable:$true] %s27_s16 }
   0x4   :  { %p548_p1 = scmp.lt.u32.totalorder %s544_s19, %s759_s1 }
   0x6   :  { %p550_p2 = pnand %p548_p1, %p545_p0 }
   0x8   :  { %553 = shalt.err (!%p550_p2)
}
   0x9   :  { %s554_s24 = scalar_lea.vmem %s28_s16, 1024  ;;  %p559_p4 = scmp.lt.s32.totalorder %s28_s16, %s28_s16 }
   0xa   :  { %p555_p3 = scmp.ne.s32.totalorder %s28_s16, %s554_s24  ;;  %p560_p5 = scmp.lt.s32.totalorder %s554_s24, %s554_s24 }
   0xc   :  { %p561_p6 = por %p560_p5, %p559_p4 }
   0xe   :  { %p562_p7 = pnand %p561_p6, %p555_p3 }
  0x10   :  { %565 = shalt.err (!%p562_p7)
}
  0x11   :  { %s639_s25 = smov 128   ;;  %s640_s26 = smov 8  }
  0x12   :  { %33 = dma.hbm_to_vmem [thread:$0]  %s759_s1, 1024, %s28_s16, [#allocation6], %s639_s25, %s639_s25, %s640_s26  }
  0x13   :  { %s641_s29 = smov [#allocation2]   ;;  %s642_s5 = smov [#allocation7]  }
  0x14   :  { %s18_s30 = sshll.u32 %s641_s29, 4  ;;  %s41_s6 = sshll.u32 %s642_s5, 4  ;;  %s19_s30 = int_to_ptr.vmem [resolvable:$true] %s18_s30  ;;  %s42_s6 = int_to_ptr.vmem [resolvable:$true] %s41_s6 }
  0x15   :  { %s566_s9 = scalar_lea.hbm %s758_s0, 64 }
  0x16   :  { %p567_p8 = scmp.ne.s32.totalorder %s758_s0, %s566_s9  ;;  %p570_p9 = scmp.lt.u32.totalorder %s566_s9, %s758_s0 }
  0x18   :  { %p572_p10 = pnand %p570_p9, %p567_p8 }
  0x1a   :  { %575 = shalt.err (!%p572_p10)
}
  0x1b   :  { %s576_s1 = scalar_lea.vmem %s19_s30, 64  ;;  %p581_p12 = scmp.lt.s32.totalorder %s19_s30, %s19_s30 }
  0x1c   :  { %p577_p11 = scmp.ne.s32.totalorder %s19_s30, %s576_s1  ;;  %p582_p13 = scmp.lt.s32.totalorder %s576_s1, %s576_s1 }
  0x1e   :  { %p583_p0 = por %p582_p13, %p581_p12 }
  0x20   :  { %p584_p1 = pnand %p583_p0, %p577_p11 }
  0x22   :  { %587 = shalt.err (!%p584_p1)
}
  0x23   :  { %21 = dma.hbm_to_vmem [thread:$0]  %s758_s0, 64, %s19_s30, [#allocation3]  }
  0x24   :  { %s588_s18 = scalar_lea.hbm %s761_s3, 2048 }
  0x25   :  { %p589_p2 = scmp.ne.s32.totalorder %s761_s3, %s588_s18  ;;  %p592_p3 = scmp.lt.u32.totalorder %s588_s18, %s761_s3 }
  0x27   :  { %p594_p4 = pnand %p592_p3, %p589_p2 }
  0x29   :  { %597 = shalt.err (!%p594_p4)
}
  0x2a   :  { %s598_s23 = scalar_lea.vmem %s42_s6, 2048  ;;  %p603_p6 = scmp.lt.s32.totalorder %s42_s6, %s42_s6 }
  0x2b   :  { %p599_p5 = scmp.ne.s32.totalorder %s42_s6, %s598_s23  ;;  %p604_p7 = scmp.lt.s32.totalorder %s598_s23, %s598_s23 }
  0x2d   :  { %p605_p8 = por %p604_p7, %p603_p6 }
  0x2f   :  { %p606_p9 = pnand %p605_p8, %p599_p5 }
  0x31   :  { %609 = shalt.err (!%p606_p9)
}
  0x32   :  { %47 = dma.hbm_to_vmem [thread:$0]  %s761_s3, 2048, %s42_s6, [#allocation6], %s639_s25, %s639_s25, %s640_s26  }
  0x33   :  { %632 = dma.done.wait [#allocation3], 64  }
  0x34   :  { %633 = vsyncadd [#allocation3], 4294967232 }
  0x35   :  { %634 = dma.done.wait [#allocation6], 3072  }
  0x36   :  { %635 = vsyncadd [#allocation6], 4294964224  ;;  %v643_v0 = vmov 0.0|0.0   ;;  %vm644_vm0 = vmmov 0   ;;  %v645_v1 = vmov 0.0   ;;  %v58_v2 = vld [vmem:[#allocation5] sm:$0xff] }
  0x37   :  { %473 = vmatprep.subr.bf16.mxu0 %v643_v0  ;;  %400 = vmatprep.mubr.msk.f32.mxu0 %vm644_vm0, %v645_v1  ;;  %v59_v3 = vld [vmem:[#allocation5 + $0x8] sm:$0xff]  ;;  %v60_v4 = vld [vmem:[#allocation5 + $0x10] sm:$0xff]  ;;  %v61_v6 = vld [vmem:[#allocation5 + $0x18] sm:$0xff]  ;;  %vm71_vm1 = vcmask 523264   ;;  %s646_s30 = smov [#allocation8]  }
  0x38   :  { %485 = vmatprep.subr.bf16.mxu1 %v643_v0  ;;  %435 = vmatprep.mubr.msk.f32.mxu1 %vm644_vm0, %v645_v1  ;;  %v474_v5 = vpack.c.bf16 %v59_v3, %v58_v2  ;;  %v477_v7 = vpack.c.bf16 %v61_v6, %v60_v4  ;;  %v145_v8 = vld [vmem:[#allocation7] sm:$0xff]  ;;  %v146_v9 = vld [vmem:[#allocation7 + $0x8] sm:$0xff]  ;;  %v147_v10 = vld [vmem:[#allocation7 + $0x10] sm:$0xff]  ;;  %s327_s5 = sshll.u32 %s646_s30, 4  ;;  %s328_s5 = int_to_ptr.vmem [resolvable:$true] %s327_s5 }
  0x39   :  { %v62_v11 = vld [vmem:[#allocation5 + $0x20] sm:$0xff]  ;;  %v63_v12 = vld [vmem:[#allocation5 + $0x28] sm:$0xff]  ;;  %v486_v13 = vpack.c.bf16 %v146_v9, %v145_v8  ;;  %v148_v14 = vld [vmem:[#allocation7 + $0x18] sm:$0xff]  ;;  %s610_s6 = scalar_lea.vmem %s328_s5, 64  ;;  %p615_p11 = scmp.lt.s32.totalorder %s328_s5, %s328_s5 }
  0x3a   :  { %475 = vmatpush3.bf16.msra.mxu0 %v474_v5  ;;  %v489_v15 = vpack.c.bf16 %v148_v14, %v147_v10  ;;  %v480_v16 = vpack.c.bf16 %v63_v12, %v62_v11  ;;  %v149_v17 = vld [vmem:[#allocation7 + $0x20] sm:$0xff]  ;;  %v150_v18 = vld [vmem:[#allocation7 + $0x28] sm:$0xff]  ;;  %v64_v19 = vld [vmem:[#allocation5 + $0x30] sm:$0xff]  ;;  %p611_p10 = scmp.ne.s32.totalorder %s328_s5, %s610_s6  ;;  %p616_p12 = scmp.lt.s32.totalorder %s610_s6, %s610_s6 }
  0x3b   :  { %476 = vmatprep.subr.bf16.mxu0 %v643_v0  ;;  %487 = vmatpush3.bf16.msra.mxu1 %v486_v13  ;;  %v65_v20 = vld [vmem:[#allocation5 + $0x38] sm:$0xff]  ;;  %v492_v21 = vpack.c.bf16 %v150_v18, %v149_v17  ;;  %v151_v23 = vld [vmem:[#allocation7 + $0x30] sm:$0xff]  ;;  %v153_v27 = vld [vmem:[#allocation7 + $0x40] sm:$0xff] }
  0x3c   :  { %488 = vmatprep.subr.bf16.mxu1 %v643_v0  ;;  %v483_v22 = vpack.c.bf16 %v65_v20, %v64_v19  ;;  %v152_v24 = vld [vmem:[#allocation7 + $0x38] sm:$0xff]  ;;  %v154_v28 = vld [vmem:[#allocation7 + $0x48] sm:$0xff]  ;;  %v155_v30 = vld [vmem:[#allocation7 + $0x50] sm:$0xff]  ;;  %p617_p13 = por %p616_p12, %p615_p11 }
  0x3d   :  { %v495_v25 = vpack.c.bf16 %v152_v24, %v151_v23  ;;  %v57_v26 = vld [vmem:[#allocation2] sm:$0xf]  ;;  %v498_v29 = vpack.c.bf16 %v154_v28, %v153_v27  ;;  %v157_v33 = vld [vmem:[#allocation7 + $0x60] sm:$0xff]  ;;  %v158_v34 = vld [vmem:[#allocation7 + $0x68] sm:$0xff] }
  0x3e   :  { %478 = vmatpush3.bf16.msra.mxu0 %v477_v7  ;;  %v156_v31 = vld [vmem:[#allocation7 + $0x58] sm:$0xff]  ;;  %v504_v35 = vpack.c.bf16 %v158_v34, %v157_v33  ;;  %v159_v36 = vld [vmem:[#allocation7 + $0x70] sm:$0xff]  ;;  %p618_p0 = pnand %p617_p13, %p611_p10 }
  0x3f   :  { %479 = vmatprep.subr.bf16.mxu0 %v643_v0  ;;  %490 = vmatpush3.bf16.msra.mxu1 %v489_v15  ;;  %v501_v32 = vpack.c.bf16 %v156_v31, %v155_v30  ;;  %v160_v37 = vld [vmem:[#allocation7 + $0x78] sm:$0xff] }
  0x40   :  { %491 = vmatprep.subr.bf16.mxu1 %v643_v0  ;;  %v507_v38 = vpack.c.bf16 %v160_v37, %v159_v36  ;;  %v337_v39 = vld [vmem:[%s760_s2] ss:$0 sm:$0xff]  ;;  %v339_v53 = vld [vmem:[%s760_s2 + $0x1] ss:$0 sm:$0xff]  ;;  %v340_v55 = vld [vmem:[%s760_s2 + $0x2] ss:$0 sm:$0xff] }
  0x42   :  { %481 = vmatpush3.bf16.msra.mxu0 %v480_v16 }
  0x43   :  { %482 = vmatprep.subr.bf16.mxu0 %v643_v0  ;;  %493 = vmatpush3.bf16.msra.mxu1 %v492_v21 }
  0x44   :  { %494 = vmatprep.subr.bf16.mxu1 %v643_v0 }
  0x46   :  { %484 = vmatpush3.bf16.msra.mxu0 %v483_v22 }
  0x47   :  { %509 = vmatprep.subr.bf16.mxu0 %v643_v0  ;;  %496 = vmatpush3.bf16.msra.mxu1 %v495_v25 }
  0x48   :  { %497 = vmatprep.subr.bf16.mxu1 %v643_v0 }
  0x49   :  { %401 = vmatmul.mubr.msk.f32.vlgmr.msra.gmra.mrb[0].mxu0 %vm71_vm1, %v57_v26 }
  0x4a   :  { %511 = vmatpush3.bf16.msra.mxu0 %v486_v13  ;;  %470 = vmatprep.mubr.msk.f32.mxu0 %vm644_vm0, %v645_v1 }
  0x4b   :  { %512 = vmatprep.subr.bf16.mxu0 %v643_v0  ;;  %499 = vmatpush3.bf16.msra.mxu1 %v498_v29 }
  0x4c   :  { %500 = vmatprep.subr.bf16.mxu1 %v643_v0 }
  0x4e   :  { %514 = vmatpush3.bf16.msra.mxu0 %v489_v15 }
  0x4f   :  { %515 = vmatprep.subr.bf16.mxu0 %v643_v0  ;;  %502 = vmatpush3.bf16.msra.mxu1 %v501_v32 }
  0x50   :  { %503 = vmatprep.subr.bf16.mxu1 %v643_v0 }
  0x52   :  { %517 = vmatpush3.bf16.msra.mxu0 %v492_v21 }
  0x53   :  { %518 = vmatprep.subr.bf16.mxu0 %v643_v0  ;;  %505 = vmatpush3.bf16.msra.mxu1 %v504_v35 }
  0x54   :  { %506 = vmatprep.subr.bf16.mxu1 %v643_v0 }
  0x56   :  { %520 = vmatpush3.bf16.msra.mxu0 %v495_v25 }
  0x57   :  { %521 = vmatprep.subr.bf16.mxu0 %v643_v0  ;;  %508 = vmatpush3.bf16.msra.mxu1 %v507_v38 }
  0x5a   :  { %523 = vmatpush3.bf16.msra.mxu0 %v498_v29 }
  0x5b   :  { %524 = vmatprep.subr.bf16.mxu0 %v643_v0 }
  0x5e   :  { %526 = vmatpush3.bf16.msra.mxu0 %v501_v32 }
  0x5f   :  { %527 = vmatprep.subr.bf16.mxu0 %v643_v0 }
  0x62   :  { %529 = vmatpush3.bf16.msra.mxu0 %v504_v35 }
  0x63   :  { %530 = vmatprep.subr.bf16.mxu0 %v643_v0 }
  0x66   :  { %532 = vmatpush3.bf16.msra.mxu0 %v507_v38 }
 0x11c   :  { %v141_v40 = vpop.f32.mrb[0].mxu0 }
 0x11d   :  { %v142_v41 = vadd.f32 %v337_v39, %v141_v40  ;;  %v402_v42 = vpop.f32.mrb[1].mxu0 }
 0x11f   :  { %v231_v43 = vmul.f32 %v142_v41, %v142_v41  ;;  %436 = vmatmul.mubr.f32.vlgmr.msra.gmra.mrb[0].mxu1 %v142_v41 }
 0x121   :  { %471 = vmatmul.mubr.f32.vlgmr.msra.gmra.mrb[2].mxu0 %v231_v43 }
 0x1f2   :  { %v227_v44 = vpop.f32.mrb[0].mxu1 }
 0x1f3   :  { %v302_v45 = vmul.f32 %v227_v44, %v227_v44  ;;  %v437_v46 = vpop.f32.mrb[1].mxu1  ;;  %v304_v51 = vsub.f32 %v142_v41, %v227_v44 }
 0x1f4   :  { %v298_v47 = vpop.f32.mrb[2].mxu0 }
 0x1f5   :  { %v303_v48 = vsub.f32 %v298_v47, %v302_v45  ;;  %v472_v49 = vpop.f32.mrb[3].mxu0 }
 0x1f7   :  { %v305_v50 = vadd.f32 1e-05, %v303_v48 }
 0x1f9   :  { %542 = vrsqrt.f32 %v305_v50 }
 0x203   :  { %v543_v52 = vpop.eup %542 }
 0x204   :  { %v307_v54 = vmul.f32 %v543_v52, %v304_v51 }
 0x206   :  { %v313_v56 = vmul.f32 %v339_v53, %v307_v54 }
 0x208   :  { %v319_v57 = vadd.f32 %v340_v55, %v313_v56 }
 0x20a   :  { %320 = vst [vmem:[#allocation8] sm:$0xf] %v319_v57 }
 0x20b   :  { %621 = shalt.err (!%p618_p0)
}
 0x20c   :  { %s622_s9 = scalar_lea.hbm %s762_s4, 64 }
 0x20d   :  { %p623_p1 = scmp.ne.s32.totalorder %s762_s4, %s622_s9  ;;  %p626_p2 = scmp.lt.u32.totalorder %s622_s9, %s762_s4 }
 0x20f   :  { %p628_p3 = pnand %p626_p2, %p623_p1 }
 0x211   :  { %631 = shalt.err (!%p628_p3)
}
 0x212   :  { %330 = dma.vmem_to_hbm [thread:$0]  %s328_s5, 64, %s762_s4, [#allocation4]  }
 0x213   :  { %636 = dma.done.wait [#allocation4], 64  }
 0x214   :  { %637 = vsyncadd [#allocation4], 4294967232 }
 0x215   :  { %334 = vsyncpa [#allocation3], 1 }
 0x216   :  { %335 = vsyncpa [#allocation6], 1 }
 0x217   :  { %336 = vsyncpa [#allocation4], 1 }

</bundles_post_ra>
